<compile_context>
chip_gen: v7x
topology: tpu7x:2x2x1
jax: 0.10.0
libtpu: 0.0.40
codegen_flags: <defaults>
</compile_context>

<pallas_src>
import functools

import jax
import jax.numpy as jnp
from jax.experimental import pallas as pl
from jax.experimental.pallas import tpu as pltpu

NUM_TASKS = 3
HIST_LEN = 10
EPSILON = 1e-8
DECAY_RATE = 0.95          # unused in forward (kept for parity with __init__)
CLIP_VALUE = 10.0          # clip_grad_norm_ no-op, see TODO above
NAN_REPLACEMENT = 1.0e6


def _awl_math(losses, w, hist, idx, hist_axis):
    """Shared forward math. `losses`/`w` have a size-1 dim on `hist_axis`."""
    # 1. sanitize loss components (NaN/Inf -> 1e6), matches the torch loop.
    bad = jnp.isnan(losses) | jnp.isinf(losses)
    losses = jnp.where(bad, jnp.float32(NAN_REPLACEMENT), losses)

    # 2. stabilized softmax over weights, weighted total loss.
    w_shift = w - jnp.max(w, axis=-1, keepdims=True)
    e = jnp.exp(w_shift)
    soft_w = e * pl.reciprocal(jnp.sum(e, axis=-1, keepdims=True), approx=False)
    total = jnp.sum(soft_w * losses, axis=-1, keepdims=True)

    # 3. ring-buffer history update; the register-resident value is reused for
    #    both the aliased writeback and the statistics (single read, no reload).
    slot = idx % HIST_LEN
    row_ids = jax.lax.broadcasted_iota(jnp.int32, hist.shape, hist_axis)
    new_hist = jnp.where(row_ids == slot, losses, hist)

    # 4. mean / unbiased std (ddof=1, matches torch.std) over updated history.
    mean = jnp.mean(new_hist, axis=hist_axis, keepdims=True)
    var = jnp.sum((new_hist - mean) ** 2, axis=hist_axis, keepdims=True) * (
        jnp.float32(1.0 / (HIST_LEN - 1)))
    std = jnp.sqrt(var) + jnp.float32(EPSILON)

    # 5. adjust_weights, gated on the post-increment index reaching HIST_LEN.
    new_idx = idx + 1
    change = jnp.clip(losses / (mean + jnp.float32(EPSILON)), 0.02, 100.0)
    norm_change = change / (jnp.sum(change, axis=-1, keepdims=True)
                            + jnp.float32(EPSILON))
    adjusted = jnp.clip(w - 0.1 * norm_change, -100.0, 100.0)
    new_w = jnp.where(new_idx >= HIST_LEN, adjusted, w)

    # 6. pack the stats slab [total | mean | std | new_weights] in registers:
    #    one fused store instead of four serialized masked row stores.
    stats = jnp.concatenate(
        [jnp.broadcast_to(total, losses.shape), mean, std, new_w],
        axis=hist_axis)
    return stats, new_hist, new_idx


# --------------------------------------------------------------------------
# Single-instance kernel (exact module semantics).
# --------------------------------------------------------------------------
def _awl_kernel(idx_ref, loss_ref, w_ref, hist_ref,
                stats_ref, new_hist_ref, new_idx_ref):
    idx = idx_ref[0]
    stats, new_hist, new_idx = _awl_math(
        loss_ref[...], w_ref[...], hist_ref[...], idx, hist_axis=0)
    stats_ref[...] = stats                 # single (4, T) store
    new_hist_ref[...] = new_hist           # aliased with the input ring buffer
    new_idx_ref[0] = new_idx               # scalar SMEM output


@functools.partial(jax.jit, donate_argnums=(2,))
def adaptive_weight_loss_forward(losses, weights, loss_history, loss_idx):
    """Functional forward of AdaptiveWeightLoss.

    Args:
      losses:       (1, NUM_TASKS) f32 loss components.
      weights:      (1, NUM_TASKS) f32 task-weight parameter.
      loss_history: (HIST_LEN, NUM_TASKS) f32 ring buffer (DONATED / updated
                    in place -- do not reuse the input array after the call).
      loss_idx:     (1,) int32 current write index.

    Returns:
      stats:    (4, NUM_TASKS) f32 slab, rows = [total | mean | std | new_w]
                (row 0 is the scalar total loss broadcast across tasks).
      new_hist: (HIST_LEN, NUM_TASKS) updated ring buffer.
      new_idx:  (1,) int32 incremented index.
    """
    stats, new_hist, new_idx = pl.pallas_call(
        _awl_kernel,
        out_shape=(
            jax.ShapeDtypeStruct((4, NUM_TASKS), jnp.float32),         # stats
            jax.ShapeDtypeStruct((HIST_LEN, NUM_TASKS), jnp.float32),  # history
            jax.ShapeDtypeStruct((1,), jnp.int32),                     # new idx
        ),
        in_specs=[
            pl.BlockSpec(memory_space=pltpu.MemorySpace.SMEM),   # loss_idx
            pl.BlockSpec(memory_space=pltpu.MemorySpace.VMEM),   # losses
            pl.BlockSpec(memory_space=pltpu.MemorySpace.VMEM),   # weights
            pl.BlockSpec(memory_space=pltpu.MemorySpace.VMEM),   # history
        ],
        out_specs=(
            pl.BlockSpec(memory_space=pltpu.MemorySpace.VMEM),
            pl.BlockSpec(memory_space=pltpu.MemorySpace.VMEM),
            pl.BlockSpec(memory_space=pltpu.MemorySpace.SMEM),
        ),
        input_output_aliases={3: 1},   # history (input 3) -> new_hist (out 1)
        cost_estimate=pl.CostEstimate(
            flops=32 * NUM_TASKS + 8 * HIST_LEN * NUM_TASKS,
            transcendentals=2 * NUM_TASKS,
            bytes_accessed=4 * (2 * HIST_LEN * NUM_TASKS + 6 * NUM_TASKS + 2)),
    )(loss_idx, losses, weights, loss_history)
    return stats, new_hist, new_idx


# --------------------------------------------------------------------------
# Batched variant: G independent AdaptiveWeightLoss instances per call.
# Amortizes the fixed launch/DMA-setup cost; on v7x the "parallel" grid axis
# shards instance groups across both TensorCores.
# --------------------------------------------------------------------------
def _awl_batched_kernel(idx_ref, loss_ref, w_ref, hist_ref,
                        stats_ref, new_hist_ref):
    idx = idx_ref[0]
    stats, new_hist, _ = _awl_math(
        loss_ref[...], w_ref[...], hist_ref[...], idx, hist_axis=1)
    stats_ref[...] = stats
    new_hist_ref[...] = new_hist


@jax.jit
def adaptive_weight_loss_forward_batched(losses, weights, loss_history,
                                         loss_idx):
    """Batched forward.

    losses/weights: (G, NUM_TASKS); loss_history: (G, HIST_LEN, NUM_TASKS);
    loss_idx: (1,) int32 shared step counter.
    TODO(synk): per-instance loss_idx (vector slot index) not supported here;
    all instances are assumed to advance in lockstep with the training step.
    """
    G, T = losses.shape
    gb = 4 if (G % 4 == 0) else G          # instance-group block size
    losses3 = losses.reshape(G, 1, T)
    weights3 = weights.reshape(G, 1, T)

    grid_spec = pltpu.PrefetchScalarGridSpec(
        num_scalar_prefetch=1,
        grid=(G // gb,),
        in_specs=[
            pl.BlockSpec((gb, 1, T), lambda g, idx: (g, 0, 0)),
            pl.BlockSpec((gb, 1, T), lambda g, idx: (g, 0, 0)),
            pl.BlockSpec((gb, HIST_LEN, T), lambda g, idx: (g, 0, 0)),
        ],
        out_specs=(
            pl.BlockSpec((gb, 4, T), lambda g, idx: (g, 0, 0)),
            pl.BlockSpec((gb, HIST_LEN, T), lambda g, idx: (g, 0, 0)),
        ),
    )
    stats, new_hist = pl.pallas_call(
        _awl_batched_kernel,
        grid_spec=grid_spec,
        out_shape=(
            jax.ShapeDtypeStruct((G, 4, T), jnp.float32),
            jax.ShapeDtypeStruct((G, HIST_LEN, T), jnp.float32),
        ),
        compiler_params=pltpu.CompilerParams(
            dimension_semantics=("parallel",)),   # v7x: shard over 2 TCs
        cost_estimate=pl.CostEstimate(
            flops=G * (32 * T + 8 * HIST_LEN * T),
            transcendentals=G * 2 * T,
            bytes_accessed=4 * G * (2 * HIST_LEN * T + 6 * T) + 8),
    )(loss_idx, losses3, weights3, loss_history)
    # TODO(synk): also alias loss_history -> new_hist here once the
    # input_output_aliases index convention under scalar prefetch is verified
    # on-device; left un-aliased to avoid risking a misalias.
    return stats, new_hist, loss_idx + 1


# --------------------------------------------------------------------------
# Pure-JAX reference (mirrors the PyTorch module) for sanity checking.
# --------------------------------------------------------------------------
def _reference(losses, weights, loss_history, loss_idx):
    losses = jnp.where(jnp.isnan(losses) | jnp.isinf(losses),
                       NAN_REPLACEMENT, losses)
    soft_w = jax.nn.softmax(weights, axis=-1)
    total = jnp.sum(soft_w * losses)
    slot = loss_idx[0] % HIST_LEN
    new_hist = loss_history.at[slot, :].set(losses[0])
    mean = jnp.mean(new_hist, axis=0, keepdims=True)
    std = jnp.std(new_hist, axis=0, ddof=1, keepdims=True) + EPSILON
    change = jnp.clip(losses / (mean + EPSILON), 0.02, 100.0)
    norm_change = change / (jnp.sum(change) + EPSILON)
    adjusted = jnp.clip(weights - 0.1 * norm_change, -100.0, 100.0)
    new_w = jnp.where(loss_idx[0] + 1 >= HIST_LEN, adjusted, weights)
    return total, new_hist, mean, std, new_w


if __name__ == "__main__":
    key = jax.random.PRNGKey(0)
    k1, k2, k3 = jax.random.split(key, 3)

    # ---- single-instance test (matches the module exactly) -----------------
    losses = jax.random.uniform(k1, (1, NUM_TASKS), jnp.float32, 0.5, 2.0)
    losses = losses.at[0, 1].set(jnp.nan)        # exercise NaN sanitization
    weights = jnp.ones((1, NUM_TASKS), jnp.float32) * 0.1
    loss_history = jnp.zeros((HIST_LEN, NUM_TASKS), jnp.float32)
    loss_idx = jnp.array([0], dtype=jnp.int32)

    # Reference first: loss_history is DONATED to the kernel call below.
    r_total, r_hist, r_mean, r_std, r_w = _reference(
        losses, weights, loss_history, loss_idx)
    jax.block_until_ready((r_total, r_hist, r_mean, r_std, r_w))

    stats, new_hist, new_idx = adaptive_weight_loss_forward(
        losses, weights, loss_history, loss_idx)
    jax.block_until_ready((stats, new_hist, new_idx))

    assert jnp.allclose(stats[0, 0], r_total, rtol=1e-5, atol=1e-5)
    assert jnp.allclose(new_hist, r_hist, rtol=1e-5, atol=1e-5)
    assert jnp.allclose(stats[1:2, :], r_mean, rtol=1e-5, atol=1e-5)
    assert jnp.allclose(stats[2:3, :], r_std, rtol=1e-5, atol=1e-5)
    assert jnp.allclose(stats[3:4, :], r_w, rtol=1e-5, atol=1e-5)
    assert int(new_idx[0]) == 1

    # ---- batched test: G instances, history full so adjust_weights fires ---
    G = 8
    b_losses = jax.random.uniform(k2, (G, NUM_TASKS), jnp.float32, 0.5, 2.0)
    b_losses = b_losses.at[3, 2].set(jnp.inf)    # exercise Inf sanitization
    b_weights = jnp.ones((G, NUM_TASKS), jnp.float32) * 0.1
    b_hist = jax.random.uniform(k3, (G, HIST_LEN, NUM_TASKS), jnp.float32,
                                0.25, 4.0)
    b_idx = jnp.array([HIST_LEN - 1], dtype=jnp.int32)   # adjust branch fires

    b_stats, b_new_hist, b_new_idx = adaptive_weight_loss_forward_batched(
        b_losses, b_weights, b_hist, b_idx)
    jax.block_until_ready((b_stats, b_new_hist, b_new_idx))

    for g in range(G):
        rt, rh, rm, rs, rw = _reference(
            b_losses[g:g + 1], b_weights[g:g + 1], b_hist[g], b_idx)
        assert jnp.allclose(b_stats[g, 0, 0], rt, rtol=1e-5, atol=1e-5)
        assert jnp.allclose(b_new_hist[g], rh, rtol=1e-5, atol=1e-5)
        assert jnp.allclose(b_stats[g, 1:2, :], rm, rtol=1e-5, atol=1e-5)
        assert jnp.allclose(b_stats[g, 2:3, :], rs, rtol=1e-5, atol=1e-5)
        assert jnp.allclose(b_stats[g, 3:4, :], rw, rtol=1e-5, atol=1e-5)
    assert int(b_new_idx[0]) == HIST_LEN

    print("KERNEL_OK")
</pallas_src>

<mosaic_0001>
module attributes {stable_mosaic.version = 11 : i64} {
  func.func @_awl_kernel(%arg0: memref<1xi32, #tpu.memory_space<smem>>, %arg1: memref<1x3xf32, #tpu.memory_space<vmem>>, %arg2: memref<1x3xf32, #tpu.memory_space<vmem>>, %arg3: memref<10x3xf32, #tpu.memory_space<vmem>>, %arg4: memref<4x3xf32, #tpu.memory_space<vmem>>, %arg5: memref<10x3xf32, #tpu.memory_space<vmem>>, %arg6: memref<1xi32, #tpu.memory_space<smem>>) attributes {dimension_semantics = [], scalar_prefetch = 0 : i64, scratch_operands = 0 : i64, tpu.core_type = #tpu.core_type<tc>} {
    %c0 = arith.constant 0 : index
    %0 = memref.load %arg0[%c0] : memref<1xi32, #tpu.memory_space<smem>>
    %c0_0 = arith.constant 0 : index
    %c0_1 = arith.constant 0 : index
    %1 = vector.load %arg1[%c0_0, %c0_1] : memref<1x3xf32, #tpu.memory_space<vmem>>, vector<1x3xf32>
    %c0_2 = arith.constant 0 : index
    %c0_3 = arith.constant 0 : index
    %2 = vector.load %arg2[%c0_2, %c0_3] : memref<1x3xf32, #tpu.memory_space<vmem>>, vector<1x3xf32>
    %c0_4 = arith.constant 0 : index
    %c0_5 = arith.constant 0 : index
    %3 = vector.load %arg3[%c0_4, %c0_5] : memref<10x3xf32, #tpu.memory_space<vmem>>, vector<10x3xf32>
    %4 = arith.cmpf one, %1, %1 : vector<1x3xf32>
    %5 = math.absf %1 : vector<1x3xf32>
    %cst = arith.constant 0x7F800000 : f32
    %6 = vector.broadcast %cst : f32 to vector<1x3xf32>
    %7 = arith.cmpf oeq, %5, %6 : vector<1x3xf32>
    %8 = arith.ori %4, %7 : vector<1x3xi1>
    %cst_6 = arith.constant 1.000000e+06 : f32
    %9 = vector.broadcast %cst_6 : f32 to vector<1x3xf32>
    %10 = arith.select %8, %9, %1 : vector<1x3xi1>, vector<1x3xf32>
    %cst_7 = arith.constant dense<0xFF800000> : vector<1xf32>
    %11 = vector.multi_reduction <maximumf>, %2, %cst_7 [1] : vector<1x3xf32> to vector<1xf32>
    %12 = vector.shape_cast %11 : vector<1xf32> to vector<1x1xf32>
    %13 = vector.broadcast %12 : vector<1x1xf32> to vector<1x3xf32>
    %14 = arith.subf %2, %13 : vector<1x3xf32>
    %15 = math.exp %14 : vector<1x3xf32>
    %cst_8 = arith.constant dense<0.000000e+00> : vector<1xf32>
    %16 = vector.multi_reduction <add>, %15, %cst_8 [1] : vector<1x3xf32> to vector<1xf32>
    %17 = vector.shape_cast %16 : vector<1xf32> to vector<1x1xf32>
    %18 = tpu.reciprocal %17 : vector<1x1xf32> -> vector<1x1xf32>
    %19 = vector.broadcast %18 : vector<1x1xf32> to vector<1x3xf32>
    %20 = arith.mulf %15, %19 : vector<1x3xf32>
    %21 = arith.mulf %20, %10 : vector<1x3xf32>
    %cst_9 = arith.constant dense<0.000000e+00> : vector<1xf32>
    %22 = vector.multi_reduction <add>, %21, %cst_9 [1] : vector<1x3xf32> to vector<1xf32>
    %23 = vector.shape_cast %22 : vector<1xf32> to vector<1x1xf32>
    %c10_i32 = arith.constant 10 : i32
    %c0_i32 = arith.constant 0 : i32
    %24 = arith.cmpi eq, %c10_i32, %c0_i32 : i32
    %c1_i32 = arith.constant 1 : i32
    %25 = arith.select %24, %c1_i32, %c10_i32 : i32
    %26 = arith.remsi %0, %25 : i32
    %c0_i32_10 = arith.constant 0 : i32
    %27 = arith.cmpi ne, %26, %c0_i32_10 : i32
    %c0_i32_11 = arith.constant 0 : i32
    %28 = arith.cmpi slt, %26, %c0_i32_11 : i32
    %c0_i32_12 = arith.constant 0 : i32
    %29 = arith.cmpi slt, %25, %c0_i32_12 : i32
    %30 = arith.xori %28, %29 : i1
    %31 = arith.andi %30, %27 : i1
    %32 = arith.addi %26, %25 : i32
    %33 = arith.select %31, %32, %26 : i32
    %34 = tpu.iota {dimensions = array<i32: 0>} : vector<10x3xi32>
    %35 = vector.broadcast %33 : i32 to vector<10x3xi32>
    %36 = arith.cmpi eq, %34, %35 : vector<10x3xi32>
    %37 = vector.shape_cast %10 : vector<1x3xf32> to vector<1x3xf32>
    %38 = vector.broadcast %37 : vector<1x3xf32> to vector<10x3xf32>
    %39 = arith.select %36, %38, %3 : vector<10x3xi1>, vector<10x3xf32>
    %cst_13 = arith.constant dense<0.000000e+00> : vector<3xf32>
    %40 = vector.multi_reduction <add>, %39, %cst_13 [0] : vector<10x3xf32> to vector<3xf32>
    %41 = vector.shape_cast %40 : vector<3xf32> to vector<1x3xf32>
    %cst_14 = arith.constant 1.000000e+01 : f32
    %42 = vector.broadcast %cst_14 : f32 to vector<1x3xf32>
    %43 = arith.divf %41, %42 : vector<1x3xf32>
    %44 = vector.broadcast %43 : vector<1x3xf32> to vector<10x3xf32>
    %45 = arith.subf %39, %44 : vector<10x3xf32>
    %46 = arith.mulf %45, %45 : vector<10x3xf32>
    %cst_15 = arith.constant dense<0.000000e+00> : vector<3xf32>
    %47 = vector.multi_reduction <add>, %46, %cst_15 [0] : vector<10x3xf32> to vector<3xf32>
    %48 = vector.shape_cast %47 : vector<3xf32> to vector<1x3xf32>
    %cst_16 = arith.constant 0.111111112 : f32
    %49 = vector.broadcast %cst_16 : f32 to vector<1x3xf32>
    %50 = arith.mulf %48, %49 : vector<1x3xf32>
    %51 = math.sqrt %50 : vector<1x3xf32>
    %cst_17 = arith.constant 9.99999993E-9 : f32
    %52 = vector.broadcast %cst_17 : f32 to vector<1x3xf32>
    %53 = arith.addf %51, %52 : vector<1x3xf32>
    %c1_i32_18 = arith.constant 1 : i32
    %54 = arith.addi %0, %c1_i32_18 : i32
    %cst_19 = arith.constant 9.99999993E-9 : f32
    %55 = vector.broadcast %cst_19 : f32 to vector<1x3xf32>
    %56 = arith.addf %43, %55 : vector<1x3xf32>
    %57 = arith.divf %10, %56 : vector<1x3xf32>
    %cst_20 = arith.constant 2.000000e-02 : f32
    %cst_21 = arith.constant 1.000000e+02 : f32
    %58 = vector.broadcast %cst_20 : f32 to vector<1x3xf32>
    %59 = arith.maximumf %58, %57 : vector<1x3xf32>
    %60 = vector.broadcast %cst_21 : f32 to vector<1x3xf32>
    %61 = arith.minimumf %60, %59 : vector<1x3xf32>
    %cst_22 = arith.constant dense<0.000000e+00> : vector<1xf32>
    %62 = vector.multi_reduction <add>, %61, %cst_22 [1] : vector<1x3xf32> to vector<1xf32>
    %63 = vector.shape_cast %62 : vector<1xf32> to vector<1x1xf32>
    %cst_23 = arith.constant 9.99999993E-9 : f32
    %64 = vector.broadcast %cst_23 : f32 to vector<1x1xf32>
    %65 = arith.addf %63, %64 : vector<1x1xf32>
    %66 = vector.broadcast %65 : vector<1x1xf32> to vector<1x3xf32>
    %67 = arith.divf %61, %66 : vector<1x3xf32>
    %cst_24 = arith.constant 1.000000e-01 : f32
    %68 = vector.broadcast %cst_24 : f32 to vector<1x3xf32>
    %69 = arith.mulf %68, %67 : vector<1x3xf32>
    %70 = arith.subf %2, %69 : vector<1x3xf32>
    %cst_25 = arith.constant -1.000000e+02 : f32
    %cst_26 = arith.constant 1.000000e+02 : f32
    %71 = vector.broadcast %cst_25 : f32 to vector<1x3xf32>
    %72 = arith.maximumf %71, %70 : vector<1x3xf32>
    %73 = vector.broadcast %cst_26 : f32 to vector<1x3xf32>
    %74 = arith.minimumf %73, %72 : vector<1x3xf32>
    %c10_i32_27 = arith.constant 10 : i32
    %75 = arith.cmpi sge, %54, %c10_i32_27 : i32
    %76 = arith.select %75, %74, %2 : vector<1x3xf32>
    %77 = vector.shape_cast %23 : vector<1x1xf32> to vector<1x1xf32>
    %78 = vector.broadcast %77 : vector<1x1xf32> to vector<1x3xf32>
    %79 = tpu.concatenate %78, %43, %53, %76 in 0 : vector<1x3xf32>, vector<1x3xf32>, vector<1x3xf32>, vector<1x3xf32> -> vector<4x3xf32>
    %c0_28 = arith.constant 0 : index
    %c0_29 = arith.constant 0 : index
    %80 = vector.load %arg4[%c0_28, %c0_29] : memref<4x3xf32, #tpu.memory_space<vmem>>, vector<4x3xf32>
    tpu.vector_store %arg4[%c0_28, %c0_29], %79 {strides = array<i32>} : memref<4x3xf32, #tpu.memory_space<vmem>>, vector<4x3xf32>,
    %c0_30 = arith.constant 0 : index
    %c0_31 = arith.constant 0 : index
    %81 = vector.load %arg5[%c0_30, %c0_31] : memref<10x3xf32, #tpu.memory_space<vmem>>, vector<10x3xf32>
    tpu.vector_store %arg5[%c0_30, %c0_31], %39 {strides = array<i32>} : memref<10x3xf32, #tpu.memory_space<vmem>>, vector<10x3xf32>,
    %c0_32 = arith.constant 0 : index
    %82 = memref.load %arg6[%c0_32] : memref<1xi32, #tpu.memory_space<smem>>
    memref.store %54, %arg6[%c0_32] : memref<1xi32, #tpu.memory_space<smem>>
    return
  }
}

</mosaic_0001>

<bundles_post_ra>
// kernel: adaptive_weight_loss_forward.1
= control target key start
LH: loop header
LB: loop body
LE: loop exit
PB: predicated region body
PF: predicated region fallthrough
CT: control target
= control target key end

     0   :  { %13 = vsyncpa [#allocation4], 0  ;;  %vm33_vm0 = vcmask 16384   ;;  %s358_s0 = inlined_call_operand.<no memory space> [shape: s32[1], index: 0, kind: input, shape index: {}]   ;;  %s359_s1 = inlined_call_operand.vmem [shape: f32[1,3], index: 1, kind: input, shape index: {}]   ;;  %s360_s2 = inlined_call_operand.vmem [shape: f32[1,3], index: 2, kind: input, shape index: {}]   ;;  %s361_s3 = inlined_call_operand.vmem [shape: f32[10,3], index: 3, kind: input, shape index: {}, may-alias: {3,5}]   ;;  %s362_s4 = inlined_call_operand.hbm [shape: f32[4,3], index: 4, kind: output, shape index: {0}]   ;;  %s363_s5 = inlined_call_operand.vmem [shape: f32[10,3], index: 5, kind: output, shape index: {1}, may-alias: {3,5}]   ;;  %s364_s6 = inlined_call_operand.hbm [shape: s32[1], index: 6, kind: output, shape index: {2}]  }
   0x1   :  { %v276_v0 = vld [vmem:[%s360_s2] sm:$0x1]  ;;  %s50_s25 = ssub.s32 0, %s358_s0 }
   0x2   :  { %v34_v1 = vsel %vm33_vm0, %v276_v0, -inf  ;;  %v24_v2 = vld [vmem:[%s359_s1] sm:$0x1]  ;;  %s181_s30 = smin.u32 %s50_s25, %s358_s0 }
   0x3   :  { %35 = vmax.xlane.f32.xlu0 %v34_v1 }
   0x4   :  { %14 = vsyncpa [#allocation5], 0  ;;  %188 = sdivrem.u32 %s181_s30, 10  ;;  %v29_v3 = vand.u32 2147483647, %v24_v2  ;;  %v62_v4 = vlaneseq  ;;  %vm28_vm1 = vcmp.ne.f32.partialorder %v24_v2, %v24_v2  ;;  %p49_p0 = scmp.lt.s32.totalorder %s358_s0, 0 }
   0x5   :  { %v26_v10 = vld [vmem:[%s361_s3] sm:$0xff]  ;;  %v27_v11 = vld [vmem:[%s361_s3 + $0x8] sm:$0x3]  ;;  %vm76_vm4 = vcmask 23552   ;;  %vm78_vm5 = vcmask 17408   ;;  %s111_s18 = sadd.s32 1, %s358_s0 }
   0x6   :  { %vm30_vm2 = vcmp.eq.f32.partialorder %v29_v3, inf  ;;  %v292_v5 = vshrl.u32 %v62_v4, 7  ;;  %149 = sst [smem:[#allocation6]] %s111_s18  ;;  %s200_s21 = scalar_lea.hbm %s364_s6, 16 }
   0x7   :  { %vm31_vm3 = vmor %vm28_vm1, %vm30_vm2  ;;  %p201_p2 = scmp.ne.s32.totalorder %s364_s6, %s200_s21  ;;  %p204_p3 = scmp.lt.u32.totalorder %s200_s21, %s364_s6 }
   0x8   :  { %v71_v6 = vsub.s32 0, %v292_v5  ;;  %v32_v7 = vsel %vm31_vm3, 1000000.0, %v24_v2  ;;  %v64_v8 = vadd.s32 8, %v292_v5 }
   0x9   :  { %p206_p4 = pnand %p204_p3, %p201_p2 }
   0xa   :  { %v72_v9 = vrot.slane %v32_v7, %v71_v6 }
   0xd   :  { %s189_s8 = spop.drf %188 }
   0xe   :  { %s54_s9 = ssub.s32 0, %s189_s8 }
   0xf   :  { %s366_s9 = smov (!%p49_p0, %s54_s9), %s189_s8 }
  0x10   :  { %p183_p1 = scmp.lt.s32.totalorder %s366_s9, 0  ;;  %s60_s1 = sadd.s32 10, %s366_s9 }
  0x12   :  { %s368_s1 = smov (!%p183_p1, %s60_s1), %s366_s9 }
  0x13   :  { %v65_v12 = vstv %s368_s1 }
  0x14   :  { %vm66_vm6 = vcmp.eq.s32.totalorder %v292_v5, %v65_v12  ;;  %vm67_vm7 = vcmp.eq.s32.totalorder %v64_v8, %v65_v12 }
  0x15   :  { %v74_v13 = vsel %vm66_vm6, %v72_v9, %v26_v10  ;;  %v75_v14 = vsel %vm67_vm7, %v72_v9, %v27_v11 }
  0x16   :  { %v77_v15 = vsel %vm76_vm4, %v74_v13, 0.0  ;;  %v79_v16 = vsel %vm78_vm5, %v75_v14, 0.0  ;;  %146 = vst.msk [vmem:[%s363_s5] sm:$0xff] %vm76_vm4, %v74_v13 }
  0x17   :  { %147 = vst.msk [vmem:[%s363_s5 + $0x8] sm:$0x3] %vm78_vm5, %v75_v14  ;;  %v80_v17 = vadd.f32 %v79_v16, %v77_v15 }
  0x19   :  { %v81_v18 = vrot.slane %v80_v17, 4 }
  0x1b   :  { %v82_v19 = vadd.f32 %v81_v18, %v80_v17 }
  0x1d   :  { %v83_v20 = vrot.slane %v82_v19, 2 }
  0x1f   :  { %v84_v21 = vadd.f32 %v83_v20, %v82_v19 }
  0x21   :  { %v85_v22 = vrot.slane %v84_v21, 1 }
  0x23   :  { %v86_v23 = vadd.f32 %v85_v22, %v84_v21 }
  0x25   :  { %v315_v24 = vmul.f32 0.1, %v86_v23 }
  0x27   :  { %v112_v25 = vadd.f32 1e-08, %v315_v24  ;;  %v89_v26 = vsub.f32 %v74_v13, %v315_v24  ;;  %v90_v27 = vsub.f32 %v75_v14, %v315_v24 }
  0x29   :  { %190 = vrcp.f32 %v112_v25  ;;  %v91_v28 = vmul.f32 %v89_v26, %v89_v26  ;;  %v92_v29 = vmul.f32 %v90_v27, %v90_v27 }
  0x2b   :  { %v93_v30 = vsel %vm76_vm4, %v91_v28, 0.0  ;;  %v94_v31 = vsel %vm78_vm5, %v92_v29, 0.0 }
  0x2c   :  { %v95_v32 = vadd.f32 %v94_v31, %v93_v30 }
  0x33   :  { %v191_v33 = vpop.eup %190 }
  0x34   :  { %v114_v34 = vmul.f32 %v191_v33, %v32_v7 }
  0x36   :  { %v115_v35 = vmax.f32 %v114_v34, 0.02 }
  0x38   :  { %v116_v36 = vmin.f32 %v115_v35, 100.0 }
  0x3a   :  { %v117_v37 = vsel %vm33_vm0, %v116_v36, 0.0 }
  0x3b   :  { %118 = vadd.xlane.f32.xlu1 %v117_v37 }
  0x90   :  { %v36_v38 = vpop.xlane.xlu0 %35 }
  0x91   :  { %v37_v39 = vsub.f32 %v276_v0, %v36_v38 }
  0x93   :  { %v38_v40 = vmul.f32 1.442695, %v37_v39 }
  0x95   :  { %192 = vpow2.f32 %v38_v40 }
  0x9f   :  { %v193_v41 = vpop.eup %192 }
  0xa0   :  { %v40_v42 = vsel %vm33_vm0, %v193_v41, 0.0 }
  0xa1   :  { %41 = vadd.xlane.f32.xlu0 %v40_v42 }
 0x12e   :  { %v42_v43 = vpop.xlane.xlu0 %41 }
 0x12f   :  { %194 = vrcp.f32 %v42_v43 }
 0x139   :  { %v195_v44 = vpop.eup %194 }
 0x13a   :  { %v44_v45 = vmul.f32 %v195_v44, %v193_v41 }
 0x13c   :  { %v45_v46 = vmul.f32 %v44_v45, %v32_v7 }
 0x13e   :  { %v46_v47 = vsel %vm33_vm0, %v45_v46, 0.0 }
 0x13f   :  { %47 = vadd.xlane.f32.xlu1 %v46_v47 }
 0x140   :  { %209 = shalt.err (!%p206_p4)
}
 0x141   :  { %s236_s25 = smov [#allocation6]   ;;  %v96_v48 = vrot.slane %v95_v32, 4  ;;  %v119_v52 = vpop.xlane.xlu1 %118  ;;  %p127_p5 = scmp.ge.s32.totalorder %s111_s18, 10  ;;  %vm138_vm11 = vcmask 1040384   ;;  %vm140_vm12 = vcmask 1041408   ;;  %vm142_vm13 = vcmask 1042432  }
 0x142   :  { %169 = dma.smem_to_hbm %s236_s25, 16, %s364_s6, [#allocation5]   ;;  %v120_v54 = vadd.f32 1e-08, %v119_v52  ;;  %vm144_vm14 = vcmask 19456  }
 0x143   :  { %v97_v49 = vadd.f32 %v96_v48, %v95_v32  ;;  %s128_s28 = scalar_select %p127_p5, 1, 0 }
 0x144   :  { %196 = vrcp.f32 %v120_v54  ;;  %s237_s6 = smov [#allocation3]  }
 0x145   :  { %v98_v50 = vrot.slane %v97_v49, 2  ;;  %v129_v63 = vstv %s128_s28  ;;  %s156_s29 = sshll.u32 %s237_s6, 4  ;;  %s157_s29 = int_to_ptr.vmem [resolvable:$true] %s156_s29 }
 0x146   :  { %vm130_vm10 = vcmp.eq.s32.totalorder %v129_v63, 1  ;;  %s210_s30 = scalar_lea.vmem %s157_s29, 64  ;;  %p215_p7 = scmp.lt.s32.totalorder %s157_s29, %s157_s29 }
 0x147   :  { %v99_v51 = vadd.f32 %v98_v50, %v97_v49  ;;  %p211_p6 = scmp.ne.s32.totalorder %s157_s29, %s210_s30  ;;  %p216_p8 = scmp.lt.s32.totalorder %s210_s30, %s210_s30 }
 0x149   :  { %v100_v53 = vrot.slane %v99_v51, 1  ;;  %p217_p9 = por %p216_p8, %p215_p7 }
 0x14b   :  { %v101_v55 = vadd.f32 %v100_v53, %v99_v51  ;;  %p218_p10 = pnand %p217_p9, %p211_p6 }
 0x14d   :  { %v102_v56 = vmul.f32 0.11111111, %v101_v55 }
 0x14e   :  { %v197_v57 = vpop.eup %196 }
 0x14f   :  { %198 = vrsqrt.f32 %v102_v56  ;;  %v122_v58 = vmul.f32 %v197_v57, %v116_v36  ;;  %vm105_vm8 = vcmp.eq.f32.partialorder %v102_v56, inf  ;;  %v108_v1 = vand.u32 2147483648, %v102_v56 }
 0x150   :  { %vm107_vm9 = vcmp.eq.f32.partialorder %v102_v56, 0.0 }
 0x151   :  { %v123_v59 = vmul.f32 0.1, %v122_v58 }
 0x153   :  { %v124_v62 = vsub.f32 %v276_v0, %v123_v59 }
 0x155   :  { %v184_v3 = vclamps-f32 %v124_v62, 100.0 }
 0x157   :  { %v131_v7 = vsel %vm130_vm10, %v184_v3, %v276_v0 }
 0x158   :  { %v136_v11 = vrot.slane %v131_v7, %v71_v6 }
 0x159   :  { %v199_v60 = vpop.eup %198 }
 0x15a   :  { %v104_v61 = vmul.f32 %v199_v60, %v102_v56 }
 0x15c   :  { %v106_v2 = vsel %vm105_vm8, %v102_v56, %v104_v61 }
 0x15d   :  { %v109_v4 = vsel %vm107_vm9, %v108_v1, %v106_v2 }
 0x15e   :  { %v110_v9 = vadd.f32 1e-08, %v109_v4 }
 0x1cc   :  { %v48_v8 = vpop.xlane.xlu1 %47 }
 0x1cd   :  { %v139_v10 = vsel %vm138_vm11, %v48_v8, %v315_v24 }
 0x1ce   :  { %v141_v12 = vsel %vm140_vm12, %v139_v10, %v110_v9 }
 0x1cf   :  { %v143_v13 = vsel %vm142_vm13, %v141_v12, %v136_v11 }
 0x1d0   :  { %145 = vst.msk [vmem:[#allocation3] sm:$0xf] %vm144_vm14, %v143_v13 }
 0x1d1   :  { %221 = shalt.err (!%p218_p10)
}
 0x1d2   :  { %s222_s8 = scalar_lea.hbm %s362_s4, 64 }
 0x1d3   :  { %p223_p11 = scmp.ne.s32.totalorder %s362_s4, %s222_s8  ;;  %p226_p12 = scmp.lt.u32.totalorder %s222_s8, %s362_s4 }
 0x1d5   :  { %p228_p13 = pnand %p226_p12, %p223_p11 }
 0x1d7   :  { %231 = shalt.err (!%p228_p13)
}
 0x1d8   :  { %159 = dma.vmem_to_hbm [thread:$0]  %s157_s29, 64, %s362_s4, [#allocation4]  }
 0x1d9   :  { %232 = dma.done.wait [#allocation4], 64  }
 0x1da   :  { %233 = vsyncadd [#allocation4], 4294967232 }
 0x1db   :  { %234 = dma.done.wait [#allocation5], 16  }
 0x1dc   :  { %235 = vsyncadd [#allocation5], 4294967280 }
 0x1dd   :  { %178 = sfence }
 0x1de   :  { %179 = vsyncpa [#allocation4], 1 }
 0x1df   :  { %180 = vsyncpa [#allocation5], 1 }

</bundles_post_ra>
